<compile_context>
chip_gen: v6e
topology: v6e:2x2x1
jax: 0.10.0
libtpu: 0.0.40
codegen_flags: <defaults>
</compile_context>

<pallas_src>
import functools

import jax
import jax.numpy as jnp
from jax.experimental import pallas as pl
from jax.experimental.pallas import tpu as pltpu

NUM_LABELS = 25
CONV_CP = 128          # lane-dense padded channel count for conv activations
VMEM_SPEC = pl.BlockSpec(memory_space=pltpu.MemorySpace.VMEM)


# --------------------------------------------------------------------------
# Fused MLP chain kernel: layer0 GEMM is K-tiled over the grid and accumulated
# in an f32 VMEM scratch; the epilogue (bias/ReLU/BN + remaining small layers)
# runs once on the last K step with all small weights resident in VMEM.
# --------------------------------------------------------------------------
def _mlp_chain_kernel(*args, relu, bn):
    n_layers = len(relu)
    n_in = 1 + sum(2 + (2 if f else 0) for f in bn)
    in_refs = args[:n_in]
    o_ref, acc_ref = args[n_in], args[n_in + 1]
    x_ref = in_refs[0]

    layers = []
    p = 1
    for l in range(n_layers):
        w, b = in_refs[p], in_refs[p + 1]
        p += 2
        s = t = None
        if bn[l]:
            s, t = in_refs[p], in_refs[p + 1]
            p += 2
        layers.append((w, b, s, t))

    k = pl.program_id(0)

    @pl.when(k == 0)
    def _init():
        acc_ref[...] = jnp.zeros_like(acc_ref)

    acc_ref[...] += jnp.dot(x_ref[...], layers[0][0][...],
                            preferred_element_type=jnp.float32)

    @pl.when(k == pl.num_programs(0) - 1)
    def _epilogue():
        w0, b0, s0, t0 = layers[0]
        y = acc_ref[...] + b0[...]
        if relu[0]:
            y = jnp.maximum(y, 0.0)
        if bn[0]:
            y = y * s0[...] + t0[...]
        for l in range(1, n_layers):
            w, b, s, t = layers[l]
            y = jnp.dot(y.astype(jnp.bfloat16), w[...],
                        preferred_element_type=jnp.float32) + b[...]
            if relu[l]:
                y = jnp.maximum(y, 0.0)
            if bn[l]:
                y = y * s[...] + t[...]
        o_ref[...] = y.astype(o_ref.dtype)


def fused_mlp_chain(x, layers, *, tk=2048, out_dtype=jnp.float32):
    """layers: sequence of (w_bf16 (K_l, N_l), b (N_l,), relu: bool, bn: None|(scale, shift))."""
    x = x.astype(jnp.bfloat16)
    M, K = x.shape
    w0 = layers[0][0]
    assert w0.shape[0] == K

    if K > tk:                               # K-tiled first GEMM (needed at prod size)
        k_pad = pl.cdiv(K, tk) * tk
        if k_pad != K:
            x = jnp.pad(x, ((0, 0), (0, k_pad - K)))
            w0 = jnp.pad(w0, ((0, k_pad - K), (0, 0)))
        grid_k, blk_k = k_pad // tk, tk
    else:
        grid_k, blk_k = 1, K

    n0 = w0.shape[1]
    n_last = layers[-1][0].shape[1]

    inputs = [x]
    in_specs = [pl.BlockSpec((M, blk_k), lambda k: (0, k))]
    relu_flags, bn_flags = [], []
    for li, (w, b, relu, bnp) in enumerate(layers):
        if li == 0:
            inputs.append(w0)
            in_specs.append(pl.BlockSpec((blk_k, n0), lambda k: (k, 0)))
        else:
            inputs.append(w)
            in_specs.append(pl.BlockSpec(w.shape, lambda k: (0, 0)))
        inputs.append(jnp.asarray(b, jnp.float32).reshape(1, -1))
        in_specs.append(pl.BlockSpec((1, w.shape[1]), lambda k: (0, 0)))
        relu_flags.append(bool(relu))
        if bnp is not None:
            s, t = bnp
            inputs.append(jnp.asarray(s, jnp.float32).reshape(1, -1))
            inputs.append(jnp.asarray(t, jnp.float32).reshape(1, -1))
            in_specs += [pl.BlockSpec((1, w.shape[1]), lambda k: (0, 0))] * 2
            bn_flags.append(True)
        else:
            bn_flags.append(False)

    kernel = functools.partial(_mlp_chain_kernel,
                               relu=tuple(relu_flags), bn=tuple(bn_flags))
    return pl.pallas_call(
        kernel,
        out_shape=jax.ShapeDtypeStruct((M, n_last), out_dtype),
        grid_spec=pltpu.PrefetchScalarGridSpec(
            num_scalar_prefetch=0,
            grid=(grid_k,),
            in_specs=in_specs,
            out_specs=pl.BlockSpec((M, n_last), lambda k: (0, 0)),
            scratch_shapes=[pltpu.VMEM((M, n0), jnp.float32)]),
        compiler_params=pltpu.CompilerParams(
            dimension_semantics=("arbitrary",)),
    )(*inputs)


# --------------------------------------------------------------------------
# Fused conv(+bias) -> ReLU -> folded BatchNorm -> 2x2/2 max-pool kernel.
# Grid over batch ("parallel").  Channels padded to 128 (lane-dense output).
# taps=None   : input is a pre-extracted im2col patch matrix (conv1, 3 input ch).
# taps=(kh,kw): im2col happens in-kernel over the lane-dense padded activation.
# --------------------------------------------------------------------------
def _conv_pool_kernel(x_ref, w_ref, b_ref, s_ref, t_ref, o_ref, y_ref, yh_ref,
                      *, taps, Ho, Wo, Hp, Wp):
    cp = o_ref.shape[-1]
    if taps is None:
        acc = jnp.dot(x_ref[0], w_ref[...], preferred_element_type=jnp.float32)
    else:
        kh, kw = taps
        cin = x_ref.shape[-1]
        x = x_ref[0]                                     # (H, W, cin) bf16
        acc = jnp.zeros((Ho * Wo, cp), jnp.float32)
        for i in range(kh):                              # in-kernel im2col (tap accumulation)
            for j in range(kw):
                xs = x[i:i + Ho, j:j + Wo, :].reshape(Ho * Wo, cin)
                wt = w_ref[(i * kw + j) * cin:(i * kw + j + 1) * cin, :]
                acc = acc + jnp.dot(xs, wt, preferred_element_type=jnp.float32)

    y = jnp.maximum(acc + b_ref[...], 0.0)               # bias + ReLU
    y_ref[...] = y * s_ref[...] + t_ref[...]             # folded BatchNorm (running stats)

    # fused 2x2 stride-2 max-pool (rows are ho*Wo + wo, row-major)
    # pool along W: even/odd column rows via sublane-strided reads
    yh_ref[...] = jnp.maximum(y_ref[pl.ds(0, Ho * Wp, 2), :],
                              y_ref[pl.ds(1, Ho * Wp, 2), :])
    # pool along H: static loop over pooled rows
    for hp in range(Hp):
        top = yh_ref[pl.ds((2 * hp) * Wp, Wp), :]
        bot = yh_ref[pl.ds((2 * hp + 1) * Wp, Wp), :]
        o_ref[0, hp] = jnp.maximum(top, bot).astype(o_ref.dtype)


def conv_pool(x, w, b, s, t, *, taps, Ho, Wo):
    assert Ho % 2 == 0 and Wo % 2 == 0
    B = x.shape[0]
    Hp, Wp = Ho // 2, Wo // 2
    cp = w.shape[1]
    tail = (0,) * (x.ndim - 1)
    in_specs = [
        pl.BlockSpec((1,) + x.shape[1:], lambda n: (n,) + tail),
        pl.BlockSpec(w.shape, lambda n: (0, 0)),
        pl.BlockSpec((1, cp), lambda n: (0, 0)),
        pl.BlockSpec((1, cp), lambda n: (0, 0)),
        pl.BlockSpec((1, cp), lambda n: (0, 0)),
    ]
    return pl.pallas_call(
        functools.partial(_conv_pool_kernel, taps=taps, Ho=Ho, Wo=Wo, Hp=Hp, Wp=Wp),
        out_shape=jax.ShapeDtypeStruct((B, Hp, Wp, cp), jnp.bfloat16),
        grid_spec=pltpu.PrefetchScalarGridSpec(
            num_scalar_prefetch=0,
            grid=(B,),
            in_specs=in_specs,
            out_specs=pl.BlockSpec((1, Hp, Wp, cp), lambda n: (n, 0, 0, 0)),
            scratch_shapes=[pltpu.VMEM((Ho * Wo, cp), jnp.float32),
                            pltpu.VMEM((Ho * Wp, cp), jnp.float32)]),
        compiler_params=pltpu.CompilerParams(dimension_semantics=("parallel",)),
    )(x, w, b, s, t)


def _im2col(x, kh, kw):  # glue im2col for the 3-channel conv1 only (cheap)
    N, H, W, C = x.shape
    Ho, Wo = H - kh + 1, W - kw + 1
    cols = [x[:, i:i + Ho, j:j + Wo, :] for i in range(kh) for j in range(kw)]
    return jnp.concatenate(cols, axis=-1).reshape(N, Ho * Wo, kh * kw * C)


# --------------------------------------------------------------------------
# Single-layer LSTM (hidden 256) + fused fc_lstm.  Input projection for all
# timesteps is one big GEMM; the T=8 recurrent loop is fully unrolled.
# PyTorch gate order [i, f, g, o]; h/c kept in f32.
# --------------------------------------------------------------------------
def _lstm_fc_kernel(x_ref, wih_ref, whh_ref, b_ref, wfc_ref, bfc_ref, o_ref,
                    *, T, N, H):
    xw = jnp.dot(x_ref[...], wih_ref[...], preferred_element_type=jnp.float32)  # (T*N, 4H)
    bias = b_ref[...]
    h = jnp.zeros((N, H), jnp.float32)
    c = jnp.zeros((N, H), jnp.float32)
    for t in range(T):                       # fully unrolled (static trip count)
        g = (xw[t * N:(t + 1) * N, :] + bias
             + jnp.dot(h.astype(jnp.bfloat16), whh_ref[...],
                       preferred_element_type=jnp.float32))
        i_g = jax.nn.sigmoid(g[:, 0 * H:1 * H])
        f_g = jax.nn.sigmoid(g[:, 1 * H:2 * H])
        g_g = jnp.tanh(g[:, 2 * H:3 * H])
        o_g = jax.nn.sigmoid(g[:, 3 * H:4 * H])
        c = f_g * c + i_g * g_g
        h = o_g * jnp.tanh(c)
    y = jnp.dot(h.astype(jnp.bfloat16), wfc_ref[...],
                preferred_element_type=jnp.float32) + bfc_ref[...]
    o_ref[...] = y.astype(o_ref.dtype)


def lstm_fc(x_btd, wih, whh, b, wfc, bfc, *, n_pad=8, out_dtype=jnp.bfloat16):
    B, T, D = x_btd.shape
    N = max(n_pad, B)                                   # pad batch for sublane efficiency
    x = jnp.pad(x_btd, ((0, N - B), (0, 0), (0, 0)))
    x = jnp.transpose(x, (1, 0, 2)).reshape(T * N, D).astype(jnp.bfloat16)
    H = whh.shape[0]
    return pl.pallas_call(
        functools.partial(_lstm_fc_kernel, T=T, N=N, H=H),
        out_shape=jax.ShapeDtypeStruct((N, wfc.shape[1]), out_dtype),
        in_specs=[VMEM_SPEC] * 6,
        out_specs=VMEM_SPEC,
    )(x, wih, whh, jnp.asarray(b, jnp.float32).reshape(1, -1),
      wfc, jnp.asarray(bfc, jnp.float32).reshape(1, -1))


# --------------------------------------------------------------------------
# Parameter construction (deterministic, synthetic), with GEMM weights in bf16
# and conv weights/bias/BN pre-padded to the 128-lane channel layout.
# --------------------------------------------------------------------------
def _bn_fold(gamma, beta, mean, var, eps=1e-5):
    scale = gamma * jax.lax.rsqrt(var + eps)
    shift = beta - mean * scale
    return scale, shift


def _pad_last(a, n):
    return jnp.pad(a, [(0, 0)] * (a.ndim - 1) + [(0, n - a.shape[-1])])


def init_params(modality_dims, img_hw=32):
    keys = iter(jax.random.split(jax.random.PRNGKey(42), 64))

    def w(shape, s=0.05):
        return (s * jax.random.normal(next(keys), shape)).astype(jnp.float32)

    p = {}
    # text classifier (ClinicalBERT hidden_size -> 256)
    p["txt_w"] = w((modality_dims["text"], 256)).astype(jnp.bfloat16)
    p["txt_b"] = w((256,))

    # image encoder
    kh = kw = 5
    c1 = w((kh, kw, 3, 20))
    p["conv1_w"] = _pad_last(c1.reshape(kh * kw * 3, 20), CONV_CP).astype(jnp.bfloat16)
    p["conv1_b"] = _pad_last(w((20,)).reshape(1, -1), CONV_CP)
    s1, t1 = _bn_fold(1.0 + w((20,)), w((20,)), w((20,)), 1.0 + jnp.abs(w((20,))))
    p["bn1_s"] = _pad_last(s1.reshape(1, -1), CONV_CP)
    p["bn1_t"] = _pad_last(t1.reshape(1, -1), CONV_CP)

    c2 = w((kh, kw, 20, 50))
    c2p = jnp.zeros((kh, kw, CONV_CP, CONV_CP), jnp.float32).at[:, :, :20, :50].set(c2)
    p["conv2_w"] = c2p.reshape(kh * kw * CONV_CP, CONV_CP).astype(jnp.bfloat16)
    p["conv2_b"] = _pad_last(w((50,)).reshape(1, -1), CONV_CP)
    s2, t2 = _bn_fold(1.0 + w((50,)), w((50,)), w((50,)), 1.0 + jnp.abs(w((50,))))
    p["bn2_s"] = _pad_last(s2.reshape(1, -1), CONV_CP)
    p["bn2_t"] = _pad_last(t2.reshape(1, -1), CONV_CP)

    h1 = (img_hw - 4) // 2
    h2 = (h1 - 4) // 2
    flat = 50 * h2 * h2          # 1250 here; 140450 at the original CXR resolution
    p["fc1_w"] = w((flat, 128)).astype(jnp.bfloat16); p["fc1_b"] = w((128,))
    p["fc2_w"] = w((128, 256)).astype(jnp.bfloat16);  p["fc2_b"] = w((256,))
    p["fc3_w"] = w((256, 256)).astype(jnp.bfloat16);  p["fc3_b"] = w((256,))

    # ts branch: 1-layer LSTM (hidden 256) + fc_lstm(256->256)
    H = 256
    p["lstm_wih"] = w((modality_dims["ts"], 4 * H)).astype(jnp.bfloat16)
    p["lstm_whh"] = w((H, 4 * H)).astype(jnp.bfloat16)
    p["lstm_b"] = w((4 * H,)) + w((4 * H,))                       # b_ih + b_hh
    p["fc_lstm_w"] = w((H, 256)).astype(jnp.bfloat16)
    p["fc_lstm_b"] = w((256,))

    # demo branch (mlp_encoder): Linear->ReLU->BN1d->Dropout->Linear->ReLU->Dropout
    p["m1_w"] = w((modality_dims["demo"], 256)).astype(jnp.bfloat16); p["m1_b"] = w((256,))
    sd, td = _bn_fold(1.0 + w((256,)), w((256,)), w((256,)), 1.0 + jnp.abs(w((256,))))
    p["bn_d_s"], p["bn_d_t"] = sd, td
    p["m2_w"] = w((256, 256)).astype(jnp.bfloat16); p["m2_b"] = w((256,))

    # fusion head ('concat'): Linear(4*256 -> 25), output lanes padded to 128
    p["outc_w"] = _pad_last(w((4 * 256, NUM_LABELS)), 128).astype(jnp.bfloat16)
    p["outc_b"] = _pad_last(w((NUM_LABELS,)).reshape(1, -1), 128).reshape(-1)
    return p


# --------------------------------------------------------------------------
# Forward pass
# --------------------------------------------------------------------------
def _pad_rows(x, m):
    return jnp.pad(x, ((0, m - x.shape[0]), (0, 0))) if x.shape[0] < m else x


def multimodal_forward(inp, model, p, *, batch_pad=8):
    text_cls, image_input, ts_input, demo_input = inp
    B = image_input.shape[0]
    M = max(batch_pad, B)                 # pad batch for MXU/vreg sublane efficiency

    # ---- text branch ----
    # TODO(synk): the pretrained ClinicalBERT encoder (AutoModel.from_pretrained) has no
    # in-script Pallas equivalent; `text_cls` is the [CLS] last_hidden_state embedding.
    text_out = fused_mlp_chain(_pad_rows(text_cls, M),
                               [(p["txt_w"], p["txt_b"], False, None)],
                               out_dtype=jnp.bfloat16)

    # ---- image branch ----
    x = jnp.transpose(image_input, (0, 2, 3, 1)).astype(jnp.bfloat16)   # NCHW -> NHWC
    H, W = x.shape[1], x.shape[2]
    patches = _im2col(x, 5, 5)                                          # (B, Ho*Wo, 75)
    a1 = conv_pool(patches, p["conv1_w"], p["conv1_b"], p["bn1_s"], p["bn1_t"],
                   taps=None, Ho=H - 4, Wo=W - 4)                       # (B, 14, 14, 128)
    a2 = conv_pool(a1, p["conv2_w"], p["conv2_b"], p["bn2_s"], p["bn2_t"],
                   taps=(5, 5), Ho=a1.shape[1] - 4, Wo=a1.shape[2] - 4)  # (B, 5, 5, 128)
    # flatten in PyTorch NCHW order to match torch.flatten(x, 1)
    feat = jnp.transpose(a2[..., :50], (0, 3, 1, 2)).reshape(B, -1)
    img_out = fused_mlp_chain(_pad_rows(feat, M),
                              [(p["fc1_w"], p["fc1_b"], True, None),
                               (p["fc2_w"], p["fc2_b"], True, None),
                               (p["fc3_w"], p["fc3_b"], True, None)],
                              tk=2048, out_dtype=jnp.bfloat16)

    # ---- ts branch ----
    ts_out = lstm_fc(ts_input, p["lstm_wih"], p["lstm_whh"], p["lstm_b"],
                     p["fc_lstm_w"], p["fc_lstm_b"], n_pad=M, out_dtype=jnp.bfloat16)

    # ---- demo branch ----
    demo_out = fused_mlp_chain(_pad_rows(demo_input.astype(jnp.float32), M),
                               [(p["m1_w"], p["m1_b"], True, (p["bn_d_s"], p["bn_d_t"])),
                                (p["m2_w"], p["m2_b"], True, None)],
                               out_dtype=jnp.bfloat16)

    outputs = [text_out, img_out, ts_out, demo_out]
    if model == "concat":
        combined = jnp.concatenate(outputs, axis=1)                     # (M, 1024) bf16
        out = fused_mlp_chain(combined, [(p["outc_w"], p["outc_b"], False, None)],
                              out_dtype=jnp.float32)
        return out[:B, :NUM_LABELS]
    # TODO(synk): 'cross' / 'self' / 'OvO' attention fusion paths (nn.MultiheadAttention
    # and the custom MultiHeadAttention class) are not implemented in this script.
    raise NotImplementedError(f"fusion mode {model!r} not implemented")


if __name__ == "__main__":
    B, T, IMG_HW = 2, 8, 32
    modality_dims = {"text": 768, "img": 3, "ts": 32, "demo": 32}
    params = init_params(modality_dims, img_hw=IMG_HW)

    k1, k2, k3, k4 = jax.random.split(jax.random.PRNGKey(0), 4)
    text_cls = jax.random.normal(k1, (B, modality_dims["text"]), jnp.float32)
    x_img = jax.random.normal(k2, (B, 3, IMG_HW, IMG_HW), jnp.float32)   # NCHW like PyTorch
    x_ts = jax.random.normal(k3, (B, T, modality_dims["ts"]), jnp.float32)
    x_demo = jax.random.normal(k4, (B, modality_dims["demo"]), jnp.float32)

    out = multimodal_forward((text_cls, x_img, x_ts, x_demo), "concat", params)
    out = jax.block_until_ready(out)

    assert out.shape == (B, NUM_LABELS), out.shape
    assert bool(jnp.all(jnp.isfinite(out)))
    print("KERNEL_OK")
</pallas_src>

<mosaic_0001>
module attributes {stable_mosaic.version = 11 : i64} {
  func.func @_mlp_chain_kernel(%arg0: i32, %arg1: memref<8x768xbf16, #tpu.memory_space<vmem>>, %arg2: memref<768x256xbf16, #tpu.memory_space<vmem>>, %arg3: memref<1x256xf32, #tpu.memory_space<vmem>>, %arg4: memref<8x256xbf16, #tpu.memory_space<vmem>>, %arg5: memref<8x256xf32, #tpu.memory_space<vmem>>) attributes {dimension_semantics = [#tpu.dimension_semantics<arbitrary>], iteration_bounds = array<i64: 1>, scalar_prefetch = 0 : i64, scratch_operands = 1 : i64, tpu.core_type = #tpu.core_type<tc>, window_params = [{transform_indices = @transform_0, window_bounds = array<i64: 8, 768>}, {transform_indices = @transform_1, window_bounds = array<i64: 768, 256>}, {pipeline_mode = #tpu.pipeline_mode<synchronous>, transform_indices = @transform_2, window_bounds = array<i64: 1, 256>}, {pipeline_mode = #tpu.pipeline_mode<synchronous>, transform_indices = @transform_3, window_bounds = array<i64: 8, 256>}]} {
    %c0_i32 = arith.constant 0 : i32
    %0 = arith.cmpi eq, %arg0, %c0_i32 : i32
    %1 = arith.extui %0 : i1 to i32
    %c0_i32_0 = arith.constant 0 : i32
    %2 = arith.cmpi ne, %1, %c0_i32_0 : i32
    scf.if %2 {
      %cst_10 = arith.constant 0.000000e+00 : f32
      %12 = vector.broadcast %cst_10 : f32 to vector<8x256xf32>
      %c0_11 = arith.constant 0 : index
      %c0_12 = arith.constant 0 : index
      %13 = vector.load %arg5[%c0_11, %c0_12] : memref<8x256xf32, #tpu.memory_space<vmem>>, vector<8x256xf32>
      tpu.vector_store %arg5[%c0_11, %c0_12], %12 {strides = array<i32>} : memref<8x256xf32, #tpu.memory_space<vmem>>, vector<8x256xf32>,
    } else {
    }
    %c0 = arith.constant 0 : index
    %c0_1 = arith.constant 0 : index
    %3 = vector.load %arg5[%c0, %c0_1] : memref<8x256xf32, #tpu.memory_space<vmem>>, vector<8x256xf32>
    %c0_2 = arith.constant 0 : index
    %c0_3 = arith.constant 0 : index
    %4 = vector.load %arg1[%c0_2, %c0_3] : memref<8x768xbf16, #tpu.memory_space<vmem>>, vector<8x768xbf16>
    %c0_4 = arith.constant 0 : index
    %c0_5 = arith.constant 0 : index
    %5 = vector.load %arg2[%c0_4, %c0_5] : memref<768x256xbf16, #tpu.memory_space<vmem>>, vector<768x256xbf16>
    %cst = arith.constant dense<0.000000e+00> : vector<8x256xf32>
    %6 = tpu.matmul %4, %5, %cst {dimension_numbers = #tpu.dot_dimension_numbers<[1], [0], [0], [1], [0, 0, 1, 1], [], []>} : vector<8x768xbf16>, vector<768x256xbf16>, vector<8x256xf32> -> vector<8x256xf32>
    %7 = arith.addf %3, %6 : vector<8x256xf32>
    %c0_6 = arith.constant 0 : index
    %c0_7 = arith.constant 0 : index
    %8 = vector.load %arg5[%c0_6, %c0_7] : memref<8x256xf32, #tpu.memory_space<vmem>>, vector<8x256xf32>
    tpu.vector_store %arg5[%c0_6, %c0_7], %7 {strides = array<i32>} : memref<8x256xf32, #tpu.memory_space<vmem>>, vector<8x256xf32>,
    %c0_i32_8 = arith.constant 0 : i32
    %9 = arith.cmpi eq, %arg0, %c0_i32_8 : i32
    %10 = arith.extui %9 : i1 to i32
    %c0_i32_9 = arith.constant 0 : i32
    %11 = arith.cmpi ne, %10, %c0_i32_9 : i32
    scf.if %11 {
      %c0_10 = arith.constant 0 : index
      %c0_11 = arith.constant 0 : index
      %12 = vector.load %arg5[%c0_10, %c0_11] : memref<8x256xf32, #tpu.memory_space<vmem>>, vector<8x256xf32>
      %c0_12 = arith.constant 0 : index
      %c0_13 = arith.constant 0 : index
      %13 = vector.load %arg3[%c0_12, %c0_13] : memref<1x256xf32, #tpu.memory_space<vmem>>, vector<1x256xf32>
      %14 = vector.broadcast %13 : vector<1x256xf32> to vector<8x256xf32>
      %15 = arith.addf %12, %14 : vector<8x256xf32>
      %16 = arith.truncf %15 : vector<8x256xf32> to vector<8x256xbf16>
      %c0_14 = arith.constant 0 : index
      %c0_15 = arith.constant 0 : index
      %17 = vector.load %arg4[%c0_14, %c0_15] : memref<8x256xbf16, #tpu.memory_space<vmem>>, vector<8x256xbf16>
      tpu.vector_store %arg4[%c0_14, %c0_15], %16 {strides = array<i32>} : memref<8x256xbf16, #tpu.memory_space<vmem>>, vector<8x256xbf16>,
    } else {
    }
    return
  }
  func.func @transform_0(%arg0: i32) -> (i32, i32) {
    %c0_i32 = arith.constant 0 : i32
    %c0_i32_0 = arith.constant 0 : i32
    return %c0_i32, %arg0 : i32, i32
  }
  func.func @transform_1(%arg0: i32) -> (i32, i32) {
    %c0_i32 = arith.constant 0 : i32
    %c0_i32_0 = arith.constant 0 : i32
    return %arg0, %c0_i32 : i32, i32
  }
  func.func @transform_2(%arg0: i32) -> (i32, i32) {
    %c0_i32 = arith.constant 0 : i32
    %c0_i32_0 = arith.constant 0 : i32
    %c0_i32_1 = arith.constant 0 : i32
    return %c0_i32, %c0_i32_0 : i32, i32
  }
  func.func @transform_3(%arg0: i32) -> (i32, i32) {
    %c0_i32 = arith.constant 0 : i32
    %c0_i32_0 = arith.constant 0 : i32
    %c0_i32_1 = arith.constant 0 : i32
    return %c0_i32, %c0_i32_0 : i32, i32
  }
}

</mosaic_0001>

<bundles_post_ra>
// kernel: tpu_custom_call.1
= control target key start
LH: loop header
LB: loop body
LE: loop exit
PB: predicated region body
PF: predicated region fallthrough
CT: control target
= control target key end

     0   :  { %8 = vsyncpa [#allocation4], 0  ;;  %s1188_s0 = inlined_call_operand.hbm [shape: bf16[8,768], index: 0, kind: input, shape index: {}]   ;;  %s1189_s1 = inlined_call_operand.hbm [shape: bf16[768,256], index: 1, kind: input, shape index: {}]   ;;  %s1190_s2 = inlined_call_operand.vmem [shape: f32[1,256], index: 2, kind: input, shape index: {}]   ;;  %s1191_s3 = inlined_call_operand.hbm [shape: bf16[8,256], index: 3, kind: output, shape index: {}]  }
   0x1   :  { %9 = vsyncpa [#allocation7], 0 }
   0x2   :  { %10 = vsyncpa [#allocation5], 0  ;;  %s1145_s12 = smov [#allocation3]   ;;  %s1146_s14 = smov [#allocation6]  }
   0x3   :  { %s17_s13 = sshll.u32 %s1145_s12, 4  ;;  %s26_s15 = sshll.u32 %s1146_s14, 4  ;;  %s18_s13 = int_to_ptr.vmem [resolvable:$true] %s17_s13  ;;  %s27_s15 = int_to_ptr.vmem [resolvable:$true] %s26_s15 }
   0x4   :  { %s1087_s16 = scalar_lea.vmem %s18_s13, 384  ;;  %p1092_p1 = scmp.lt.s32.totalorder %s18_s13, %s18_s13 }
   0x5   :  { %p1088_p0 = scmp.ne.s32.totalorder %s18_s13, %s1087_s16  ;;  %p1093_p2 = scmp.lt.s32.totalorder %s1087_s16, %s1087_s16 }
   0x7   :  { %p1094_p3 = por %p1093_p2, %p1092_p1 }
   0x9   :  { %p1095_p4 = pnand %p1094_p3, %p1088_p0 }
   0xb   :  { %1098 = shalt.err (!%p1095_p4)
}
   0xc   :  { %20 = dma.hbm_to_vmem [thread:$0]  %s1188_s0, 384, %s18_s13, [#allocation4]  }
   0xd   :  { %s1107_s19 = scalar_lea.vmem %s27_s15, 12288  ;;  %p1112_p6 = scmp.lt.s32.totalorder %s27_s15, %s27_s15 }
   0xe   :  { %p1108_p5 = scmp.ne.s32.totalorder %s27_s15, %s1107_s19  ;;  %p1113_p7 = scmp.lt.s32.totalorder %s1107_s19, %s1107_s19 }
  0x10   :  { %p1114_p8 = por %p1113_p7, %p1112_p6 }
  0x12   :  { %p1115_p9 = pnand %p1114_p8, %p1108_p5 }
  0x14   :  { %1118 = shalt.err (!%p1115_p9)
}
  0x15   :  { %s1147_s20 = smov 128   ;;  %s1148_s21 = smov 8  }
  0x16   :  { %32 = dma.hbm_to_vmem [thread:$0]  %s1189_s1, 12288, %s27_s15, [#allocation7], %s1147_s20, %s1147_s20, %s1148_s21  }
  0x17   :  { %1139 = dma.done.wait [#allocation4], 384  }
  0x18   :  { %1140 = vsyncadd [#allocation4], 4294966912 }
  0x19   :  { %1141 = dma.done.wait [#allocation7], 12288  }
  0x1a   :  { %1142 = vsyncadd [#allocation7], 4294955008  ;;  %v929_v0 = vld [vmem:[#allocation6 + $0x74] ss:$8 sps:$4 sm:$0xff]   ;;  %v933_v2 = vld [vmem:[#allocation6 + $0x70] ss:$8 sps:$4 sm:$0xff]  }
  0x1b   :  { %v931_v1 = vld [vmem:[#allocation6 + $0x174] ss:$8 sps:$4 sm:$0xff]   ;;  %649 = vmatprep.subr.bf16.mxu0 %v929_v0  ;;  %v934_v3 = vld [vmem:[#allocation6 + $0x170] ss:$8 sps:$4 sm:$0xff]   ;;  %v935_v4 = vld [vmem:[#allocation6 + $0x64] ss:$8 sps:$4 sm:$0xff]  }
  0x1c   :  { %690 = vmatprep.subr.bf16.mxu1 %v931_v1  ;;  %650 = vmatpush1.bf16.msra.mxu0 %v933_v2  ;;  %v937_v5 = vld [vmem:[#allocation6 + $0x164] ss:$8 sps:$4 sm:$0xff]   ;;  %v939_v6 = vld [vmem:[#allocation6 + $0x60] ss:$8 sps:$4 sm:$0xff]   ;;  %v941_v8 = vld [vmem:[#allocation6 + $0x54] ss:$8 sps:$4 sm:$0xff]  }
  0x1d   :  { %691 = vmatpush1.bf16.msra.mxu1 %v934_v3  ;;  %651 = vmatprep.subr.bf16.mxu0 %v935_v4  ;;  %v940_v7 = vld [vmem:[#allocation6 + $0x160] ss:$8 sps:$4 sm:$0xff]   ;;  %v943_v9 = vld [vmem:[#allocation6 + $0x154] ss:$8 sps:$4 sm:$0xff]   ;;  %v945_v10 = vld [vmem:[#allocation6 + $0x50] ss:$8 sps:$4 sm:$0xff]  }
  0x1e   :  { %692 = vmatprep.subr.bf16.mxu1 %v937_v5  ;;  %v946_v11 = vld [vmem:[#allocation6 + $0x150] ss:$8 sps:$4 sm:$0xff]   ;;  %v947_v12 = vld [vmem:[#allocation6 + $0x44] ss:$8 sps:$4 sm:$0xff]   ;;  %v951_v14 = vld [vmem:[#allocation6 + $0x40] ss:$8 sps:$4 sm:$0xff]  }
  0x1f   :  { %v949_v13 = vld [vmem:[#allocation6 + $0x144] ss:$8 sps:$4 sm:$0xff]   ;;  %v952_v15 = vld [vmem:[#allocation6 + $0x140] ss:$8 sps:$4 sm:$0xff]   ;;  %v953_v16 = vld [vmem:[#allocation6 + $0x34] ss:$8 sps:$4 sm:$0xff]  }
  0x20   :  { %652 = vmatpush1.bf16.msra.mxu0 %v939_v6  ;;  %v955_v17 = vld [vmem:[#allocation6 + $0x134] ss:$8 sps:$4 sm:$0xff]   ;;  %v957_v18 = vld [vmem:[#allocation6 + $0x30] ss:$8 sps:$4 sm:$0xff]   ;;  %v959_v20 = vld [vmem:[#allocation6 + $0x24] ss:$8 sps:$4 sm:$0xff]  }
  0x21   :  { %693 = vmatpush1.bf16.msra.mxu1 %v940_v7  ;;  %653 = vmatprep.subr.bf16.mxu0 %v941_v8  ;;  %v958_v19 = vld [vmem:[#allocation6 + $0x130] ss:$8 sps:$4 sm:$0xff]   ;;  %v961_v21 = vld [vmem:[#allocation6 + $0x124] ss:$8 sps:$4 sm:$0xff]   ;;  %v963_v22 = vld [vmem:[#allocation6 + $0x20] ss:$8 sps:$4 sm:$0xff]  }
  0x22   :  { %694 = vmatprep.subr.bf16.mxu1 %v943_v9  ;;  %v964_v23 = vld [vmem:[#allocation6 + $0x120] ss:$8 sps:$4 sm:$0xff]   ;;  %v965_v24 = vld [vmem:[#allocation6 + $0x14] ss:$8 sps:$4 sm:$0xff]   ;;  %v969_v26 = vld [vmem:[#allocation6 + $0x10] ss:$8 sps:$4 sm:$0xff]  }
  0x23   :  { %v967_v25 = vld [vmem:[#allocation6 + $0x114] ss:$8 sps:$4 sm:$0xff]   ;;  %v970_v27 = vld [vmem:[#allocation6 + $0x110] ss:$8 sps:$4 sm:$0xff]   ;;  %v971_v28 = vld [vmem:[#allocation6 + $0x4] ss:$8 sps:$4 sm:$0xff]  }
  0x24   :  { %654 = vmatpush1.bf16.msra.mxu0 %v945_v10  ;;  %v973_v29 = vld [vmem:[#allocation6 + $0x104] ss:$8 sps:$4 sm:$0xff]   ;;  %v975_v30 = vld [vmem:[#allocation6] ss:$8 sps:$4 sm:$0xff]   ;;  %v977_v32 = vld [vmem:[#allocation6 + $0xf4] ss:$8 sps:$4 sm:$0xff]  }
  0x25   :  { %695 = vmatpush1.bf16.msra.mxu1 %v946_v11  ;;  %655 = vmatprep.subr.bf16.mxu0 %v947_v12  ;;  %v976_v31 = vld [vmem:[#allocation6 + $0x100] ss:$8 sps:$4 sm:$0xff]   ;;  %v979_v33 = vld [vmem:[#allocation6 + $0x1f4] ss:$8 sps:$4 sm:$0xff]   ;;  %v981_v34 = vld [vmem:[#allocation6 + $0xf0] ss:$8 sps:$4 sm:$0xff]  }
  0x26   :  { %696 = vmatprep.subr.bf16.mxu1 %v949_v13  ;;  %v982_v35 = vld [vmem:[#allocation6 + $0x1f0] ss:$8 sps:$4 sm:$0xff]   ;;  %v983_v36 = vld [vmem:[#allocation6 + $0xe4] ss:$8 sps:$4 sm:$0xff]   ;;  %v987_v38 = vld [vmem:[#allocation6 + $0xe0] ss:$8 sps:$4 sm:$0xff]  }
  0x27   :  { %v985_v37 = vld [vmem:[#allocation6 + $0x1e4] ss:$8 sps:$4 sm:$0xff]   ;;  %v988_v39 = vld [vmem:[#allocation6 + $0x1e0] ss:$8 sps:$4 sm:$0xff]   ;;  %v989_v40 = vld [vmem:[#allocation6 + $0xd4] ss:$8 sps:$4 sm:$0xff]  }
  0x28   :  { %656 = vmatpush1.bf16.msra.mxu0 %v951_v14  ;;  %v991_v41 = vld [vmem:[#allocation6 + $0x1d4] ss:$8 sps:$4 sm:$0xff]   ;;  %v993_v42 = vld [vmem:[#allocation6 + $0xd0] ss:$8 sps:$4 sm:$0xff]   ;;  %v995_v44 = vld [vmem:[#allocation6 + $0xc4] ss:$8 sps:$4 sm:$0xff]  }
  0x29   :  { %697 = vmatpush1.bf16.msra.mxu1 %v952_v15  ;;  %657 = vmatprep.subr.bf16.mxu0 %v953_v16  ;;  %v994_v43 = vld [vmem:[#allocation6 + $0x1d0] ss:$8 sps:$4 sm:$0xff]   ;;  %v997_v45 = vld [vmem:[#allocation6 + $0x1c4] ss:$8 sps:$4 sm:$0xff]   ;;  %v999_v49 = vld [vmem:[#allocation6 + $0xc0] ss:$8 sps:$4 sm:$0xff]  }
  0x2a   :  { %698 = vmatprep.subr.bf16.mxu1 %v955_v17  ;;  %v49_v46 = vld [vmem:[#allocation3] sm:$0xff]  ;;  %v50_v48 = vld [vmem:[#allocation3 + $0x8] sm:$0xff]  ;;  %v1176_v8 = vld [vmem:[#allocation3 + $0x10] sm:$0xff]  ;;  %s1149_s24 = smov [#allocation8]  }
  0x2b   :  { %v821_v47 = vcombine.high %v49_v46, %v49_v46  ;;  %v1000_v50 = vld [vmem:[#allocation6 + $0x1c0] ss:$8 sps:$4 sm:$0xff]   ;;  %v823_v51 = vcombine.high %v50_v48, %v50_v48  ;;  %v1001_v52 = vld [vmem:[#allocation6 + $0xb4] ss:$8 sps:$4 sm:$0xff]   ;;  %v1005_v54 = vld [vmem:[#allocation6 + $0xb0] ss:$8 sps:$4 sm:$0xff]   ;;  %v820_v5 = vcombine.low %v49_v46, %v49_v46  ;;  %v822_v6 = vcombine.low %v50_v48, %v50_v48 }
  0x2c   :  { %658 = vmatpush1.bf16.msra.mxu0 %v957_v18  ;;  %v1003_v53 = vld [vmem:[#allocation6 + $0x1b4] ss:$8 sps:$4 sm:$0xff]   ;;  %v1006_v55 = vld [vmem:[#allocation6 + $0x1b0] ss:$8 sps:$4 sm:$0xff]   ;;  %v1007_v56 = vld [vmem:[#allocation6 + $0xa4] ss:$8 sps:$4 sm:$0xff]   ;;  %v825_v10 = vcombine.high %v1176_v8, %v1176_v8 }
  0x2d   :  { %699 = vmatpush1.bf16.msra.mxu1 %v958_v19  ;;  %659 = vmatprep.subr.bf16.mxu0 %v959_v20  ;;  %v1009_v57 = vld [vmem:[#allocation6 + $0x1a4] ss:$8 sps:$4 sm:$0xff]   ;;  %v1011_v58 = vld [vmem:[#allocation6 + $0xa0] ss:$8 sps:$4 sm:$0xff]   ;;  %v1013_v60 = vld [vmem:[#allocation6 + $0x94] ss:$8 sps:$4 sm:$0xff]  }
  0x2e   :  { %700 = vmatprep.subr.bf16.mxu1 %v961_v21  ;;  %681 = vmatprep.mubr.bf16.mxu0 %v821_v47  ;;  %v1012_v59 = vld [vmem:[#allocation6 + $0x1a0] ss:$8 sps:$4 sm:$0xff]   ;;  %v1015_v61 = vld [vmem:[#allocation6 + $0x194] ss:$8 sps:$4 sm:$0xff]   ;;  %v1017_v62 = vld [vmem:[#allocation6 + $0x90] ss:$8 sps:$4 sm:$0xff]  }
  0x2f   :  { %722 = vmatprep.mubr.bf16.mxu1 %v823_v51  ;;  %v1018_v63 = vld [vmem:[#allocation6 + $0x190] ss:$8 sps:$4 sm:$0xff]   ;;  %v1019_v0 = vld [vmem:[#allocation6 + $0x84] ss:$8 sps:$4 sm:$0xff]   ;;  %v1023_v2 = vld [vmem:[#allocation6 + $0x80] ss:$8 sps:$4 sm:$0xff]  }
  0x30   :  { %660 = vmatpush1.bf16.msra.mxu0 %v963_v22  ;;  %v1021_v1 = vld [vmem:[#allocation6 + $0x184] ss:$8 sps:$4 sm:$0xff]   ;;  %v1024_v3 = vld [vmem:[#allocation6 + $0x180] ss:$8 sps:$4 sm:$0xff]   ;;  %v1031_v4 = vld [vmem:[#allocation6 + $0x274] ss:$8 sps:$4 sm:$0xff]  }
  0x31   :  { %701 = vmatpush1.bf16.msra.mxu1 %v964_v23  ;;  %661 = vmatprep.subr.bf16.mxu0 %v965_v24  ;;  %v1029_v7 = vld [vmem:[#allocation6 + $0x270] ss:$8 sps:$4 sm:$0xff]   ;;  %v1034_v9 = vld [vmem:[#allocation6 + $0x264] ss:$8 sps:$4 sm:$0xff]   ;;  %v1032_v11 = vld [vmem:[#allocation6 + $0x260] ss:$8 sps:$4 sm:$0xff]  }
  0x32   :  { %702 = vmatprep.subr.bf16.mxu1 %v967_v25  ;;  %v1037_v12 = vld [vmem:[#allocation6 + $0x254] ss:$8 sps:$4 sm:$0xff]   ;;  %v1035_v13 = vld [vmem:[#allocation6 + $0x250] ss:$8 sps:$4 sm:$0xff]   ;;  %v1040_v14 = vld [vmem:[#allocation6 + $0x244] ss:$8 sps:$4 sm:$0xff]  }
  0x33   :  { %v1038_v15 = vld [vmem:[#allocation6 + $0x240] ss:$8 sps:$4 sm:$0xff]   ;;  %v1043_v16 = vld [vmem:[#allocation6 + $0x234] ss:$8 sps:$4 sm:$0xff]   ;;  %v1041_v17 = vld [vmem:[#allocation6 + $0x230] ss:$8 sps:$4 sm:$0xff]  }
  0x34   :  { %662 = vmatpush1.bf16.msra.mxu0 %v969_v26  ;;  %v1046_v18 = vld [vmem:[#allocation6 + $0x224] ss:$8 sps:$4 sm:$0xff]   ;;  %v1044_v19 = vld [vmem:[#allocation6 + $0x220] ss:$8 sps:$4 sm:$0xff]   ;;  %v1049_v20 = vld [vmem:[#allocation6 + $0x214] ss:$8 sps:$4 sm:$0xff]  }
  0x35   :  { %703 = vmatpush1.bf16.msra.mxu1 %v970_v27  ;;  %663 = vmatprep.subr.bf16.mxu0 %v971_v28  ;;  %v1047_v21 = vld [vmem:[#allocation6 + $0x210] ss:$8 sps:$4 sm:$0xff]   ;;  %v1052_v22 = vld [vmem:[#allocation6 + $0x204] ss:$8 sps:$4 sm:$0xff]   ;;  %v1050_v23 = vld [vmem:[#allocation6 + $0x200] ss:$8 sps:$4 sm:$0xff]  }
  0x36   :  { %704 = vmatprep.subr.bf16.mxu1 %v973_v29  ;;  %v1055_v24 = vld [vmem:[#allocation6 + $0x2f4] ss:$8 sps:$4 sm:$0xff]   ;;  %v1053_v25 = vld [vmem:[#allocation6 + $0x2f0] ss:$8 sps:$4 sm:$0xff]   ;;  %v1058_v26 = vld [vmem:[#allocation6 + $0x2e4] ss:$8 sps:$4 sm:$0xff]  }
  0x37   :  { %v1056_v27 = vld [vmem:[#allocation6 + $0x2e0] ss:$8 sps:$4 sm:$0xff]   ;;  %v1061_v28 = vld [vmem:[#allocation6 + $0x2d4] ss:$8 sps:$4 sm:$0xff]   ;;  %v1059_v29 = vld [vmem:[#allocation6 + $0x2d0] ss:$8 sps:$4 sm:$0xff]  }
  0x38   :  { %664 = vmatpush1.bf16.msra.mxu0 %v975_v30  ;;  %v1064_v30 = vld [vmem:[#allocation6 + $0x2c4] ss:$8 sps:$4 sm:$0xff]   ;;  %s810_s25 = sshll.u32 %s1149_s24, 4  ;;  %s811_s25 = int_to_ptr.vmem [resolvable:$true] %s810_s25 }
  0x39   :  { %705 = vmatpush1.bf16.msra.mxu1 %v976_v31  ;;  %665 = vmatprep.subr.bf16.mxu0 %v977_v32  ;;  %v1062_v31 = vld [vmem:[#allocation6 + $0x2c0] ss:$8 sps:$4 sm:$0xff]   ;;  %v1067_v32 = vld [vmem:[#allocation6 + $0x2b4] ss:$8 sps:$4 sm:$0xff]   ;;  %s1119_s26 = scalar_lea.vmem %s811_s25, 128  ;;  %p1124_p11 = scmp.lt.s32.totalorder %s811_s25, %s811_s25 }
  0x3a   :  { %706 = vmatprep.subr.bf16.mxu1 %v979_v33  ;;  %v1065_v33 = vld [vmem:[#allocation6 + $0x2b0] ss:$8 sps:$4 sm:$0xff]   ;;  %p1120_p10 = scmp.ne.s32.totalorder %s811_s25, %s1119_s26  ;;  %p1125_p12 = scmp.lt.s32.totalorder %s1119_s26, %s1119_s26 }
  0x3c   :  { %666 = vmatpush2.bf16.msra.mxu0 %v981_v34  ;;  %v1070_v34 = vld [vmem:[#allocation6 + $0x2a4] ss:$8 sps:$4 sm:$0xff]   ;;  %p1126_p13 = por %p1125_p12, %p1124_p11 }
  0x3d   :  { %707 = vmatpush2.bf16.msra.mxu1 %v982_v35  ;;  %667 = vmatprep.subr.bf16.mxu0 %v983_v36  ;;  %v1068_v35 = vld [vmem:[#allocation6 + $0x2a0] ss:$8 sps:$4 sm:$0xff]   ;;  %v1073_v36 = vld [vmem:[#allocation6 + $0x294] ss:$8 sps:$4 sm:$0xff]  }
  0x3e   :  { %708 = vmatprep.subr.bf16.mxu1 %v985_v37  ;;  %v1071_v37 = vld [vmem:[#allocation6 + $0x290] ss:$8 sps:$4 sm:$0xff]   ;;  %p1127_p0 = pnand %p1126_p13, %p1120_p10 }
  0x40   :  { %668 = vmatpush2.bf16.msra.mxu0 %v987_v38  ;;  %v1076_v38 = vld [vmem:[#allocation6 + $0x284] ss:$8 sps:$4 sm:$0xff]  }
  0x41   :  { %709 = vmatpush2.bf16.msra.mxu1 %v988_v39  ;;  %669 = vmatprep.subr.bf16.mxu0 %v989_v40  ;;  %v1074_v39 = vld [vmem:[#allocation6 + $0x280] ss:$8 sps:$4 sm:$0xff]   ;;  %v824_v40 = vcombine.low %v1176_v8, %v1176_v8 }
  0x42   :  { %710 = vmatprep.subr.bf16.mxu1 %v991_v41 }
  0x44   :  { %670 = vmatpush2.bf16.msra.mxu0 %v993_v42 }
  0x45   :  { %711 = vmatpush2.bf16.msra.mxu1 %v994_v43  ;;  %671 = vmatprep.subr.bf16.mxu0 %v995_v44 }
  0x46   :  { %712 = vmatprep.subr.bf16.mxu1 %v997_v45 }
  0x48   :  { %672 = vmatpush2.bf16.msra.mxu0 %v999_v49 }
  0x49   :  { %713 = vmatpush2.bf16.msra.mxu1 %v1000_v50  ;;  %673 = vmatprep.subr.bf16.mxu0 %v1001_v52  ;;  %v783_v50 = vlaneseq }
  0x4a   :  { %714 = vmatprep.subr.bf16.mxu1 %v1003_v53 }
  0x4b   :  { %v784_v51 = vshrl.u32 %v783_v50, 7 }
  0x4c   :  { %674 = vmatpush2.bf16.msra.mxu0 %v1005_v54  ;;  %v781_v54 = vld [vmem:[%s1190_s2] sm:$0x3] }
  0x4d   :  { %715 = vmatpush2.bf16.msra.mxu1 %v1006_v55  ;;  %675 = vmatprep.subr.bf16.mxu0 %v1007_v56  ;;  %v785_v52 = vsub.s32 0, %v784_v51  ;;  %v789_v53 = vsub.s32 1, %v784_v51 }
  0x4e   :  { %716 = vmatprep.subr.bf16.mxu1 %v1009_v57 }
  0x50   :  { %676 = vmatpush2.bf16.msra.mxu0 %v1011_v58  ;;  %v786_v58 = vrot.slane %v781_v54, %v785_v52 }
  0x51   :  { %717 = vmatpush2.bf16.msra.mxu1 %v1012_v59  ;;  %677 = vmatprep.subr.bf16.mxu0 %v1013_v60  ;;  %v790_v59 = vrot.slane %v781_v54, %v789_v53 }
  0x52   :  { %718 = vmatprep.subr.bf16.mxu1 %v1015_v61 }
  0x54   :  { %678 = vmatpush2.bf16.msra.mxu0 %v1017_v62 }
  0x55   :  { %719 = vmatpush2.bf16.msra.mxu1 %v1018_v63  ;;  %679 = vmatprep.subr.bf16.mxu0 %v1019_v0 }
  0x56   :  { %720 = vmatprep.subr.bf16.mxu1 %v1021_v1 }
  0x58   :  { %680 = vmatpush2.bf16.msra.mxu0 %v1023_v2 }
  0x59   :  { %721 = vmatpush2.bf16.msra.mxu1 %v1024_v3  ;;  %731 = vmatprep.subr.bf16.mxu0 %v1031_v4 }
  0x5b   :  { %682 = vmatmul.mubr.bf16.vlgmr.msra.gmra.mxu0 %v820_v5 }
  0x5c   :  { %723 = vmatmul.mubr.bf16.vlgmr.msra.gmra.mxu1 %v822_v6  ;;  %732 = vmatpush1.bf16.msra.mxu0 %v1029_v7 }
  0x5d   :  { %763 = vmatprep.mubr.bf16.mxu0 %v825_v10  ;;  %733 = vmatprep.subr.bf16.mxu0 %v1034_v9 }
  0x60   :  { %734 = vmatpush1.bf16.msra.mxu0 %v1032_v11 }
  0x61   :  { %735 = vmatprep.subr.bf16.mxu0 %v1037_v12 }
  0x64   :  { %736 = vmatpush1.bf16.msra.mxu0 %v1035_v13 }
  0x65   :  { %737 = vmatprep.subr.bf16.mxu0 %v1040_v14 }
  0x68   :  { %738 = vmatpush1.bf16.msra.mxu0 %v1038_v15 }
  0x69   :  { %739 = vmatprep.subr.bf16.mxu0 %v1043_v16 }
  0x6c   :  { %740 = vmatpush1.bf16.msra.mxu0 %v1041_v17 }
  0x6d   :  { %741 = vmatprep.subr.bf16.mxu0 %v1046_v18 }
  0x70   :  { %742 = vmatpush1.bf16.msra.mxu0 %v1044_v19 }
  0x71   :  { %743 = vmatprep.subr.bf16.mxu0 %v1049_v20 }
  0x74   :  { %744 = vmatpush1.bf16.msra.mxu0 %v1047_v21 }
  0x75   :  { %745 = vmatprep.subr.bf16.mxu0 %v1052_v22 }
  0x78   :  { %746 = vmatpush1.bf16.msra.mxu0 %v1050_v23 }
  0x79   :  { %747 = vmatprep.subr.bf16.mxu0 %v1055_v24 }
  0x7c   :  { %748 = vmatpush2.bf16.msra.mxu0 %v1053_v25 }
  0x7d   :  { %749 = vmatprep.subr.bf16.mxu0 %v1058_v26 }
  0x80   :  { %750 = vmatpush2.bf16.msra.mxu0 %v1056_v27 }
  0x81   :  { %751 = vmatprep.subr.bf16.mxu0 %v1061_v28 }
  0x84   :  { %752 = vmatpush2.bf16.msra.mxu0 %v1059_v29 }
  0x85   :  { %753 = vmatprep.subr.bf16.mxu0 %v1064_v30 }
  0x88   :  { %754 = vmatpush2.bf16.msra.mxu0 %v1062_v31 }
  0x89   :  { %755 = vmatprep.subr.bf16.mxu0 %v1067_v32 }
  0x8c   :  { %756 = vmatpush2.bf16.msra.mxu0 %v1065_v33 }
  0x8d   :  { %757 = vmatprep.subr.bf16.mxu0 %v1070_v34 }
  0x90   :  { %758 = vmatpush2.bf16.msra.mxu0 %v1068_v35 }
  0x91   :  { %759 = vmatprep.subr.bf16.mxu0 %v1073_v36 }
  0x94   :  { %760 = vmatpush2.bf16.msra.mxu0 %v1071_v37 }
  0x95   :  { %761 = vmatprep.subr.bf16.mxu0 %v1076_v38 }
  0x98   :  { %762 = vmatpush2.bf16.msra.mxu0 %v1074_v39 }
  0x9b   :  { %764 = vmatmul.mubr.bf16.vlgmr.msra.gmra.mxu0 %v824_v40 }
 0x11b   :  { %v683_v41 = vpop.f32.mrf.mxu0 }
 0x11c   :  { %v724_v42 = vpop.f32.mrf.mxu1 }
 0x11d   :  { %v725_v43 = vadd.f32 %v724_v42, %v683_v41  ;;  %v685_v44 = vpop.f32.mrf.mxu0 }
 0x11e   :  { %v726_v45 = vpop.f32.mrf.mxu1 }
 0x11f   :  { %v687_v46 = vpop.f32.mrf.mxu0  ;;  %v727_v56 = vadd.f32 %v726_v45, %v685_v44 }
 0x120   :  { %v728_v47 = vpop.f32.mrf.mxu1 }
 0x121   :  { %v688_v48 = vpop.f32.mrf.mxu0 }
 0x122   :  { %v729_v49 = vpop.f32.mrf.mxu1 }
 0x15b   :  { %v765_v55 = vpop.f32.mrf.mxu0 }
 0x15c   :  { %v766_v57 = vadd.f32 %v765_v55, %v725_v43 }
 0x15d   :  { %v767_v60 = vpop.f32.mrf.mxu0 }
 0x15e   :  { %v768_v61 = vadd.f32 %v767_v60, %v727_v56  ;;  %v793_v63 = vadd.f32 %v786_v58, %v766_v57 }
 0x15f   :  { %v769_v62 = vpop.f32.mrf.mxu0 }
 0x160   :  { %v794_v0 = vadd.f32 %v790_v59, %v768_v61 }
 0x161   :  { %v770_v1 = vpop.f32.mrf.mxu0 }
 0x162   :  { %v923_v2 = vpack.c.bf16 %v794_v0, %v793_v63 }
 0x164   :  { %803 = vst [vmem:[#allocation8] sm:$0xff] %v923_v2 }
 0x165   :  { %1130 = shalt.err (!%p1127_p0)
}
 0x166   :  { %813 = dma.vmem_to_hbm [thread:$0]  %s811_s25, 128, %s1191_s3, [#allocation5]  }
 0x167   :  { %1143 = dma.done.wait [#allocation5], 128  }
 0x168   :  { %1144 = vsyncadd [#allocation5], 4294967168 }
 0x169   :  { %817 = vsyncpa [#allocation4], 1 }
 0x16a   :  { %818 = vsyncpa [#allocation7], 1 }
 0x16b   :  { %819 = vsyncpa [#allocation5], 1 }

</bundles_post_ra>
